<compile_context>
chip_gen: v6e
topology: v6e:2x2x1
jax: 0.10.0
libtpu: 0.0.40
codegen_flags: <defaults>
</compile_context>

<pallas_src>
import jax
import jax.numpy as jnp
from jax.experimental import pallas as pl
from jax.experimental.pallas import tpu as pltpu


# ----------------------------------------------------------------------------
# Kernel: Gaussian-basis expansion + exp for one row tile.
#   y     : (TR, M, 1)  precomputed mul*x + bias (any float dtype)
#   means : (1, 1, K)   basis centers
#   negt  : (1, 1, K)   -|temps|
#   out   : (TR, M, K)  lane-dense (K on lanes), written in final dtype
# ----------------------------------------------------------------------------
def rbf_kernel(y_ref, means_ref, negt_ref, o_ref):
    y = y_ref[...].astype(jnp.float32)                     # (TR, M, 1)  VPU (cast is free)
    d = y - means_ref[...]                                  # (TR, M, K)  lane broadcast
    o_ref[...] = jnp.exp(d * d * negt_ref[...]).astype(o_ref.dtype)   # EUP exp


def _pick_row_tile(R, M, K, block_rows, target_bytes):
    """Row-tile size: ~target_bytes of f32 output block, multiple of 8, <= R."""
    if block_rows is not None:
        return max(1, min(block_rows, R))
    row_bytes = max(M * K * 4, 1)
    tr = (target_bytes // row_bytes) // 8 * 8
    tr = max(8, tr)
    return min(tr, R)


# ----------------------------------------------------------------------------
# Wrapper
# ----------------------------------------------------------------------------
def rbf_forward(x, edge_types, params, *, block_rows=None,
                target_block_bytes=4 << 20,
                vmem_limit_bytes=48 * 1024 * 1024,
                core_parallel=False):
    """x: (B, N, N) float, edge_types: (B, N, N) int -> (B, N, N, K)."""
    B, N1, N2 = x.shape
    K = params["means"].shape[0]
    out_dtype = params["means"].dtype

    # Tiny parameter prep (amortizable to once-per-model).
    means3 = params["means"].astype(jnp.float32).reshape(1, 1, K)
    negt3 = (-jnp.abs(params["temps"].astype(jnp.float32))).reshape(1, 1, K)

    # TODO(synk): embedding gather has no clean Pallas TPU equivalent; done in
    # XLA here and fused with the affine below.
    mul_e = jnp.take(params["mul_w"].reshape(-1), edge_types, axis=0)
    bias_e = jnp.take(params["bias_w"].reshape(-1), edge_types, axis=0)
    y = mul_e * x + bias_e                                   # (B, N, N)

    R, M = B * N1, N2
    y3 = y.reshape(R, M, 1)

    tr = _pick_row_tile(R, M, K, block_rows, target_block_bytes)
    grid = (pl.cdiv(R, tr),)

    dim_sem = (pltpu.CORE_PARALLEL,) if core_parallel else ("parallel",)

    out = pl.pallas_call(
        rbf_kernel,
        out_shape=jax.ShapeDtypeStruct((R, M, K), out_dtype),
        grid_spec=pltpu.PrefetchScalarGridSpec(
            num_scalar_prefetch=0,
            grid=grid,
            in_specs=[pl.BlockSpec((tr, M, 1), lambda i: (i, 0, 0)),
                      pl.BlockSpec((1, 1, K), lambda i: (0, 0, 0)),
                      pl.BlockSpec((1, 1, K), lambda i: (0, 0, 0))],
            out_specs=pl.BlockSpec((tr, M, K), lambda i: (i, 0, 0)),
        ),
        compiler_params=pltpu.CompilerParams(
            dimension_semantics=dim_sem,
            vmem_limit_bytes=vmem_limit_bytes,
        ),
    )(y3, means3, negt3)

    return out.reshape(B, N1, N2, K)


# ----------------------------------------------------------------------------
# Pure-JAX reference (mirrors the PyTorch forward literally)
# ----------------------------------------------------------------------------
def reference(x, edge_types, params):
    mul = params["mul_w"][edge_types]                 # (B, N, N, 1)
    bias = params["bias_w"][edge_types]               # (B, N, N, 1)
    y = mul * x[..., None] + bias                     # (B, N, N, 1)
    mean = params["means"].astype(jnp.float32)        # (K,)
    temp = jnp.abs(params["temps"].astype(jnp.float32))
    return jnp.exp(jnp.square(y - mean) * (-temp)).astype(params["means"].dtype)


if __name__ == "__main__":
    # Small shapes: batch=2, n_node=16 (pairwise 16x16), K=128 kernels, 8 edge types.
    B, N, K, E = 2, 16, 128, 8

    key = jax.random.PRNGKey(0)
    k1, k2, k3, k4, k5, k6 = jax.random.split(key, 6)

    params = {
        "means": jax.random.uniform(k1, (K,), jnp.float32, 0.0, 3.0),
        "temps": jax.random.uniform(k2, (K,), jnp.float32, 0.1, 10.0),
        # Module inits mul=1 / bias=0; randomized here so the embedding path is
        # actually exercised by the correctness check.
        "mul_w": jax.random.uniform(k3, (E, 1), jnp.float32, 0.5, 1.5),
        "bias_w": jax.random.uniform(k4, (E, 1), jnp.float32, -0.5, 0.5),
    }
    x = jax.random.uniform(k5, (B, N, N), jnp.float32, 0.0, 3.0)
    edge_types = jax.random.randint(k6, (B, N, N), 0, E, dtype=jnp.int32)

    ref = reference(x, edge_types, params)

    # 1) even grid, pipelined (R=32, tr=8 -> 4 steps)
    out = jax.block_until_ready(rbf_forward(x, edge_types, params, block_rows=8))
    assert out.shape == (B, N, N, K)
    err = jnp.max(jnp.abs(out - ref))
    assert jnp.allclose(out, ref, rtol=1e-4, atol=1e-5), f"max err {err}"

    # 2) non-dividing grid (R=32, tr=24 -> cdiv=2, bounds-clipped trailing block)
    out2 = jax.block_until_ready(rbf_forward(x, edge_types, params, block_rows=24))
    err2 = jnp.max(jnp.abs(out2 - ref))
    assert jnp.allclose(out2, ref, rtol=1e-4, atol=1e-5), f"max err {err2}"

    # 3) default auto-sized tile (whole problem fits in one ~4 MiB-target block)
    out3 = jax.block_until_ready(rbf_forward(x, edge_types, params))
    err3 = jnp.max(jnp.abs(out3 - ref))
    assert jnp.allclose(out3, ref, rtol=1e-4, atol=1e-5), f"max err {err3}"

    print("KERNEL_OK")
</pallas_src>

<mosaic_0001>
module attributes {stable_mosaic.version = 11 : i64} {
  func.func @rbf_kernel(%arg0: i32, %arg1: memref<8x16x1xf32, #tpu.memory_space<vmem>>, %arg2: memref<1x1x128xf32, #tpu.memory_space<vmem>>, %arg3: memref<1x1x128xf32, #tpu.memory_space<vmem>>, %arg4: memref<8x16x128xf32, #tpu.memory_space<vmem>>) attributes {dimension_semantics = [#tpu.dimension_semantics<parallel>], iteration_bounds = array<i64: 4>, scalar_prefetch = 0 : i64, scratch_operands = 0 : i64, tpu.core_type = #tpu.core_type<tc>, window_params = [{transform_indices = @transform_0, window_bounds = array<i64: 8, 16, 1>}, {pipeline_mode = #tpu.pipeline_mode<synchronous>, transform_indices = @transform_1, window_bounds = array<i64: 1, 1, 128>}, {pipeline_mode = #tpu.pipeline_mode<synchronous>, transform_indices = @transform_2, window_bounds = array<i64: 1, 1, 128>}, {transform_indices = @transform_3, window_bounds = array<i64: 8, 16, 128>}]} {
    %c0 = arith.constant 0 : index
    %c0_0 = arith.constant 0 : index
    %c0_1 = arith.constant 0 : index
    %0 = vector.load %arg1[%c0, %c0_0, %c0_1] : memref<8x16x1xf32, #tpu.memory_space<vmem>>, vector<8x16x1xf32>
    %c0_2 = arith.constant 0 : index
    %c0_3 = arith.constant 0 : index
    %c0_4 = arith.constant 0 : index
    %1 = vector.load %arg2[%c0_2, %c0_3, %c0_4] : memref<1x1x128xf32, #tpu.memory_space<vmem>>, vector<1x1x128xf32>
    %2 = vector.broadcast %0 : vector<8x16x1xf32> to vector<8x16x128xf32>
    %3 = vector.broadcast %1 : vector<1x1x128xf32> to vector<8x16x128xf32>
    %4 = arith.subf %2, %3 : vector<8x16x128xf32>
    %5 = arith.mulf %4, %4 : vector<8x16x128xf32>
    %c0_5 = arith.constant 0 : index
    %c0_6 = arith.constant 0 : index
    %c0_7 = arith.constant 0 : index
    %6 = vector.load %arg3[%c0_5, %c0_6, %c0_7] : memref<1x1x128xf32, #tpu.memory_space<vmem>>, vector<1x1x128xf32>
    %7 = vector.broadcast %6 : vector<1x1x128xf32> to vector<8x16x128xf32>
    %8 = arith.mulf %5, %7 : vector<8x16x128xf32>
    %9 = math.exp %8 : vector<8x16x128xf32>
    %c0_8 = arith.constant 0 : index
    %c0_9 = arith.constant 0 : index
    %c0_10 = arith.constant 0 : index
    %10 = vector.load %arg4[%c0_8, %c0_9, %c0_10] : memref<8x16x128xf32, #tpu.memory_space<vmem>>, vector<8x16x128xf32>
    tpu.vector_store %arg4[%c0_8, %c0_9, %c0_10], %9 {strides = array<i32>} : memref<8x16x128xf32, #tpu.memory_space<vmem>>, vector<8x16x128xf32>,
    return
  }
  func.func @transform_0(%arg0: i32) -> (i32, i32, i32) {
    %c0_i32 = arith.constant 0 : i32
    %c0_i32_0 = arith.constant 0 : i32
    %c0_i32_1 = arith.constant 0 : i32
    return %arg0, %c0_i32, %c0_i32_0 : i32, i32, i32
  }
  func.func @transform_1(%arg0: i32) -> (i32, i32, i32) {
    %c0_i32 = arith.constant 0 : i32
    %c0_i32_0 = arith.constant 0 : i32
    %c0_i32_1 = arith.constant 0 : i32
    %c0_i32_2 = arith.constant 0 : i32
    return %c0_i32, %c0_i32_0, %c0_i32_1 : i32, i32, i32
  }
  func.func @transform_2(%arg0: i32) -> (i32, i32, i32) {
    %c0_i32 = arith.constant 0 : i32
    %c0_i32_0 = arith.constant 0 : i32
    %c0_i32_1 = arith.constant 0 : i32
    %c0_i32_2 = arith.constant 0 : i32
    return %c0_i32, %c0_i32_0, %c0_i32_1 : i32, i32, i32
  }
  func.func @transform_3(%arg0: i32) -> (i32, i32, i32) {
    %c0_i32 = arith.constant 0 : i32
    %c0_i32_0 = arith.constant 0 : i32
    %c0_i32_1 = arith.constant 0 : i32
    return %arg0, %c0_i32, %c0_i32_0 : i32, i32, i32
  }
}

</mosaic_0001>

<bundles_post_ra>
// kernel: tpu_custom_call.1
= control target key start
LH: loop header
LB: loop body
LE: loop exit
PB: predicated region body
PF: predicated region fallthrough
CT: control target
= control target key end

     0   :  { %8 = vsyncpa [#allocation3], 0  ;;  %s805_s0 = inlined_call_operand.vmem [shape: f32[32,16,1], index: 0, kind: input, shape index: {}]   ;;  %s806_s1 = inlined_call_operand.vmem [shape: f32[1,1,128], index: 1, kind: input, shape index: {}]   ;;  %s807_s2 = inlined_call_operand.vmem [shape: f32[1,1,128], index: 2, kind: input, shape index: {}]   ;;  %s808_s3 = inlined_call_operand.hbm [shape: f32[32,16,128], index: 3, kind: output, shape index: {}]  }
   0x1   :  { %10 = vsyncpa [#allocation3 + $0x1], 0  ;;  %s639_s12 = smov 0   ;;  %s641_s13 = smov 0  }
   0x2   :  { %s643_s14 = smov 0   ;;  %s645_s15 = smov 0  }
   0x3 LB: > { %s660_s16 = sadd.s32 4294967295, %s613_s15   ;;  %s458_s17 = sadd.s32 4294967294, %s613_s15   ;;  %s613_s15 = sphi %s645_s15, %s814_s15   ;;  %s609_s14 = sphi %s643_s14, %s813_s14   ;;  %s605_s13 = sphi %s641_s13, %s812_s13   ;;  %s601_s12 = sphi %s639_s12, %s811_s12  }
   0x4   : > { %s664_s18 = sadd.s32 1, %s613_s15   ;;  %s91_s19 = sadd.s32 1, %s609_s14 }
   0x5   : > { %s88_s20 = ssub.s32 %s613_s15, %s664_s18  ;;  %p101_p0 = scmp.ne.s32.totalorder %s609_s14, %s605_s13 }
   0x6   : > { %p89_p1 = scmp.eq.s32.totalorder %s88_s20, 0  ;;  %p102_p2 = scmp.eq.s32.totalorder %s660_s16, 3 }
   0x7   : > { %p107_p3 = scmp.ne.s32.totalorder %s605_s13, %s601_s12  ;;  %p108_p4 = scmp.eq.s32.totalorder %s458_s17, 3 }
   0x8   : > { %s675_s21 = scalar_select %p89_p1, %s609_s14, %s91_s19  }
   0x9   : > { %p677_p5 = por %p102_p2, %p101_p0  ;;  %p681_p6 = por %p108_p4, %p107_p3 }
   0xa   : > { %p461_p7 = scmp.ge.s32.totalorder %s613_s15, 1  ;;  %p142_p8 = scmp.lt.s32.totalorder %s613_s15, 5 }
   0xc   : > { %p143_p9 = pnand %p461_p7, %p142_p8 }
   0xd   : > { %s463_s24 = sshll.u32 (!%p143_p9), %s660_s16, 3  ;;  %s164_s6 = sand.u32 (!%p143_p9), 1, %s605_s13  }
   0xe   : > { %146 = sbr.rel (%p143_p9) target bundleno = 212 (0xd4), region = 32  ;;  %p168_p10 = scmp.lt.s32.totalorder (!%p143_p9), %s463_s24, 31 }
   0xf   : > { %s462_s7 = sshll.u32 (!%p143_p9), %s164_s6, 7  ;;  %s476_s9 = sshll.u32 (!%p143_p9), %s660_s16, 11 }
  0x10   : > { %s726_s8 = scalar_lea.vmem (!%p143_p9), [#allocation2], %s462_s7  ;;  %s757_s19 = scalar_lea.hbm (!%p143_p9), %s808_s3, %s476_s9 }
  0x11   : > { %s396_s10 = sshll.u32 (!%p143_p9), %s726_s8, 4  ;;  %s765_s16 = scalar_lea.sflag (!%p143_p9), [#allocation3], %s164_s6  ;;  %s759_s10 = int_to_ptr.vmem [resolvable:$true] %s396_s10 }
  0x12   : > { %s553_s20 = scalar_lea.vmem (!%p143_p9), %s759_s10, 2048 }
  0x13   : > { %v615_v0 = vmov 0   ;;  %s816_s24 = smov (!%p168_p10, %s463_s24), 31  ;;  %v694_v17 = vld [vmem:[%s806_s1] ss:$0 sm:$0xff]  ;;  %p554_p11 = scmp.ne.s32.totalorder %s759_s10, %s553_s20 }
  0x14   : > { %520 = vset.pattern.permute.xlu1 %v615_v0  ;;  %519 = vset.pattern.permute.xlu0 %v615_v0  ;;  %s474_s25 = sshll.u32 %s816_s24, 4  ;;  %v701_v22 = vld [vmem:[%s807_s2] ss:$0 sm:$0xff]  ;;  %s616_s24 = smov [#allocation2]  }
  0x15   : > { %s172_s28 = scalar_lea.vmem %s805_s0, %s474_s25  ;;  %p555_p12 = pnand %p554_p11, %p677_p5 }
  0x16   : > { %v177_v1 = vld [vmem:[%s172_s28 + $0x10] sm:$0xff]  ;;  %v175_v2 = vld [vmem:[%s172_s28] sm:$0xff]  ;;  %v178_v3 = vld [vmem:[%s172_s28 + $0x18] sm:$0xff]  ;;  %s557_s25 = sshll.u32 %s616_s24, 4  ;;  %s558_s25 = int_to_ptr.vmem [resolvable:$false] %s557_s25 }
  0x17   : > { %204 = vperm.xlu1 %520, %v177_v1   ;;  %194 = vperm.xlu0 %519, %v175_v2   ;;  %v176_v4 = vld [vmem:[%s172_s28 + $0x8] sm:$0xff]  ;;  %v179_v6 = vld [vmem:[%s172_s28 + $0x20] sm:$0xff]  ;;  %v182_v7 = vld [vmem:[%s172_s28 + $0x38] sm:$0xff]  ;;  %p556_p13 = pneg %p555_p12  ;;  %s559_s26 = scalar_lea.vmem %s558_s25, 4096 }
  0x18   : > { %v180_v5 = vld [vmem:[%s172_s28 + $0x28] sm:$0xff]  ;;  %v181_v8 = vld [vmem:[%s172_s28 + $0x30] sm:$0xff]  ;;  %v183_v10 = vld [vmem:[%s172_s28 + $0x40] sm:$0xff]  ;;  %p560_p0 = scmp.lt.s32.totalorder %s759_s10, %s558_s25  ;;  %p561_p1 = scmp.lt.s32.totalorder %s559_s26, %s553_s20 }
  0x19   : > { %v184_v9 = vld [vmem:[%s172_s28 + $0x48] sm:$0xff]  ;;  %v186_v11 = vld [vmem:[%s172_s28 + $0x58] sm:$0xff]  ;;  %v185_v12 = vld [vmem:[%s172_s28 + $0x50] sm:$0xff] }
  0x1a   : > { %v188_v13 = vld [vmem:[%s172_s28 + $0x68] sm:$0xff]  ;;  %v187_v14 = vld [vmem:[%s172_s28 + $0x60] sm:$0xff]  ;;  %v190_v15 = vld [vmem:[%s172_s28 + $0x78] sm:$0xff]  ;;  %p562_p2 = por %p561_p1, %p560_p0 }
  0x1b   : > { %209 = vperm.xlu1 %520, %v178_v3   ;;  %199 = vperm.xlu0 %519, %v176_v4   ;;  %v189_v16 = vld [vmem:[%s172_s28 + $0x70] sm:$0xff] }
  0x1c   : > { %p563_p3 = pnand %p562_p2, %p556_p13 }
  0x1f   : > { %219 = vperm.xlu1 %520, %v180_v5   ;;  %214 = vperm.xlu0 %519, %v179_v6  }
  0x23   : > { %229 = vperm.xlu1 %520, %v182_v7   ;;  %224 = vperm.xlu0 %519, %v181_v8  }
  0x27   : > { %239 = vperm.xlu1 %520, %v184_v9   ;;  %234 = vperm.xlu0 %519, %v183_v10  }
  0x2b   : > { %249 = vperm.xlu1 %520, %v186_v11   ;;  %244 = vperm.xlu0 %519, %v185_v12  }
  0x2f   : > { %259 = vperm.xlu1 %520, %v188_v13   ;;  %254 = vperm.xlu0 %519, %v187_v14  }
  0x33   : > { %269 = vperm.xlu1 %520, %v190_v15   ;;  %264 = vperm.xlu0 %519, %v189_v16  }
  0x92   : > { %v205_v18 = vpop.permute.xlu1 %204  ;;  %v195_v19 = vpop.permute.xlu0 %194 }
  0x93   : > { %v280_v20 = vsub.f32 %v205_v18, %v694_v17  ;;  %v278_v21 = vsub.f32 %v195_v19, %v694_v17 }
  0x95   : > { %v296_v23 = vmul.f32 %v280_v20, %v280_v20  ;;  %v294_v24 = vmul.f32 %v278_v21, %v278_v21 }
  0x96   : > { %v210_v25 = vpop.permute.xlu1 %209  ;;  %v200_v26 = vpop.permute.xlu0 %199 }
  0x97   : > { %v319_v27 = vmul.f32 %v701_v22, %v296_v23  ;;  %v317_v28 = vmul.f32 %v701_v22, %v294_v24  ;;  %v281_v29 = vsub.f32 %v210_v25, %v694_v17  ;;  %v279_v30 = vsub.f32 %v200_v26, %v694_v17 }
  0x99   : > { %v337_v31 = vmul.f32 1.442695, %v319_v27  ;;  %v333_v32 = vmul.f32 1.442695, %v317_v28  ;;  %v297_v33 = vmul.f32 %v281_v29, %v281_v29  ;;  %v295_v34 = vmul.f32 %v279_v30, %v279_v30 }
  0x9a   : > { %v220_v35 = vpop.permute.xlu1 %219  ;;  %v215_v36 = vpop.permute.xlu0 %214 }
  0x9b   : > { %521 = vpow2.f32 %v337_v31  ;;  %v320_v37 = vmul.f32 %v701_v22, %v297_v33  ;;  %v318_v38 = vmul.f32 %v701_v22, %v295_v34  ;;  %v283_v39 = vsub.f32 %v220_v35, %v694_v17 }
  0x9c   : > { %523 = vpow2.f32 %v333_v32  ;;  %v282_v40 = vsub.f32 %v215_v36, %v694_v17 }
  0x9d   : > { %v339_v41 = vmul.f32 1.442695, %v320_v37  ;;  %v335_v42 = vmul.f32 1.442695, %v318_v38  ;;  %v299_v43 = vmul.f32 %v283_v39, %v283_v39 }
  0x9e   : > { %v298_v44 = vmul.f32 %v282_v40, %v282_v40  ;;  %v230_v45 = vpop.permute.xlu1 %229  ;;  %v225_v46 = vpop.permute.xlu0 %224 }
  0x9f   : > { %525 = vpow2.f32 %v339_v41  ;;  %v322_v47 = vmul.f32 %v701_v22, %v299_v43  ;;  %v285_v48 = vsub.f32 %v230_v45, %v694_v17  ;;  %v284_v49 = vsub.f32 %v225_v46, %v694_v17 }
  0xa0   : > { %527 = vpow2.f32 %v335_v42  ;;  %v321_v50 = vmul.f32 %v701_v22, %v298_v44 }
  0xa1   : > { %v343_v51 = vmul.f32 1.442695, %v322_v47  ;;  %v301_v52 = vmul.f32 %v285_v48, %v285_v48  ;;  %v300_v53 = vmul.f32 %v284_v49, %v284_v49 }
  0xa2   : > { %v341_v54 = vmul.f32 1.442695, %v321_v50  ;;  %v240_v55 = vpop.permute.xlu1 %239  ;;  %v235_v56 = vpop.permute.xlu0 %234 }
  0xa3   : > { %529 = vpow2.f32 %v343_v51  ;;  %v324_v57 = vmul.f32 %v701_v22, %v301_v52  ;;  %v323_v58 = vmul.f32 %v701_v22, %v300_v53  ;;  %v287_v59 = vsub.f32 %v240_v55, %v694_v17 }
  0xa4   : > { %531 = vpow2.f32 %v341_v54  ;;  %v286_v60 = vsub.f32 %v235_v56, %v694_v17 }
  0xa5   : > { %v347_v61 = vmul.f32 1.442695, %v324_v57  ;;  %v345_v62 = vmul.f32 1.442695, %v323_v58  ;;  %v303_v63 = vmul.f32 %v287_v59, %v287_v59 }
  0xa6   : > { %v302_v0 = vmul.f32 %v286_v60, %v286_v60  ;;  %v250_v1 = vpop.permute.xlu1 %249  ;;  %v245_v2 = vpop.permute.xlu0 %244 }
  0xa7   : > { %533 = vpow2.f32 %v347_v61  ;;  %v326_v3 = vmul.f32 %v701_v22, %v303_v63  ;;  %v289_v4 = vsub.f32 %v250_v1, %v694_v17  ;;  %v288_v5 = vsub.f32 %v245_v2, %v694_v17 }
  0xa8   : > { %v522_v6 = vpop.eup %521  ;;  %535 = vpow2.f32 %v345_v62  ;;  %v325_v7 = vmul.f32 %v701_v22, %v302_v0 }
  0xa9   : > { %v524_v8 = vpop.eup %523  ;;  %367 = vst [vmem:[%s726_s8 + $0x10] sm:$0xff] %v522_v6  ;;  %v351_v9 = vmul.f32 1.442695, %v326_v3  ;;  %v305_v10 = vmul.f32 %v289_v4, %v289_v4  ;;  %v304_v11 = vmul.f32 %v288_v5, %v288_v5 }
  0xaa   : > { %365 = vst [vmem:[%s726_s8] sm:$0xff] %v524_v8  ;;  %v349_v12 = vmul.f32 1.442695, %v325_v7  ;;  %v260_v13 = vpop.permute.xlu1 %259  ;;  %v255_v14 = vpop.permute.xlu0 %254 }
  0xab   : > { %537 = vpow2.f32 %v351_v9  ;;  %v328_v15 = vmul.f32 %v701_v22, %v305_v10  ;;  %v327_v16 = vmul.f32 %v701_v22, %v304_v11  ;;  %v291_v18 = vsub.f32 %v260_v13, %v694_v17 }
  0xac   : > { %v526_v19 = vpop.eup %525  ;;  %539 = vpow2.f32 %v349_v12  ;;  %v290_v20 = vsub.f32 %v255_v14, %v694_v17 }
  0xad   : > { %v528_v21 = vpop.eup %527  ;;  %368 = vst [vmem:[%s726_s8 + $0x18] sm:$0xff] %v526_v19  ;;  %v355_v23 = vmul.f32 1.442695, %v328_v15  ;;  %v353_v24 = vmul.f32 1.442695, %v327_v16  ;;  %v307_v25 = vmul.f32 %v291_v18, %v291_v18 }
  0xae   : > { %366 = vst [vmem:[%s726_s8 + $0x8] sm:$0xff] %v528_v21  ;;  %v306_v26 = vmul.f32 %v290_v20, %v290_v20  ;;  %v270_v27 = vpop.permute.xlu1 %269  ;;  %v265_v28 = vpop.permute.xlu0 %264 }
  0xaf   : > { %541 = vpow2.f32 %v355_v23  ;;  %v330_v29 = vmul.f32 %v701_v22, %v307_v25  ;;  %v293_v30 = vsub.f32 %v270_v27, %v694_v17  ;;  %v292_v31 = vsub.f32 %v265_v28, %v694_v17 }
  0xb0   : > { %v530_v32 = vpop.eup %529  ;;  %543 = vpow2.f32 %v353_v24  ;;  %v329_v33 = vmul.f32 %v701_v22, %v306_v26 }
  0xb1   : > { %v532_v34 = vpop.eup %531  ;;  %370 = vst [vmem:[%s726_s8 + $0x28] sm:$0xff] %v530_v32  ;;  %v359_v35 = vmul.f32 1.442695, %v330_v29  ;;  %v309_v36 = vmul.f32 %v293_v30, %v293_v30  ;;  %v308_v37 = vmul.f32 %v292_v31, %v292_v31 }
  0xb2   : > { %369 = vst [vmem:[%s726_s8 + $0x20] sm:$0xff] %v532_v34  ;;  %v357_v38 = vmul.f32 1.442695, %v329_v33 }
  0xb3   : > { %545 = vpow2.f32 %v359_v35  ;;  %v332_v39 = vmul.f32 %v701_v22, %v309_v36  ;;  %v331_v17 = vmul.f32 %v701_v22, %v308_v37 }
  0xb4   : > { %v534_v40 = vpop.eup %533  ;;  %547 = vpow2.f32 %v357_v38 }
  0xb5   : > { %v536_v41 = vpop.eup %535  ;;  %372 = vst [vmem:[%s726_s8 + $0x38] sm:$0xff] %v534_v40  ;;  %v363_v42 = vmul.f32 1.442695, %v332_v39  ;;  %v361_v43 = vmul.f32 1.442695, %v331_v17 }
  0xb6   : > { %371 = vst [vmem:[%s726_s8 + $0x30] sm:$0xff] %v536_v41 }
  0xb7   : > { %549 = vpow2.f32 %v363_v42 }
  0xb8   : > { %v538_v44 = vpop.eup %537  ;;  %551 = vpow2.f32 %v361_v43 }
  0xb9   : > { %v540_v45 = vpop.eup %539  ;;  %374 = vst [vmem:[%s726_s8 + $0x48] sm:$0xff] %v538_v44 }
  0xba   : > { %373 = vst [vmem:[%s726_s8 + $0x40] sm:$0xff] %v540_v45 }
  0xbc   : > { %v542_v22 = vpop.eup %541 }
  0xbd   : > { %v544_v46 = vpop.eup %543  ;;  %376 = vst [vmem:[%s726_s8 + $0x58] sm:$0xff] %v542_v22 }
  0xbe   : > { %375 = vst [vmem:[%s726_s8 + $0x50] sm:$0xff] %v544_v46 }
  0xc0   : > { %v546_v47 = vpop.eup %545 }
  0xc1   : > { %v548_v48 = vpop.eup %547  ;;  %378 = vst [vmem:[%s726_s8 + $0x68] sm:$0xff] %v546_v47 }
  0xc2   : > { %377 = vst [vmem:[%s726_s8 + $0x60] sm:$0xff] %v548_v48 }
  0xc4   : > { %v550_v49 = vpop.eup %549 }
  0xc5   : > { %v552_v50 = vpop.eup %551  ;;  %380 = vst [vmem:[%s726_s8 + $0x78] sm:$0xff] %v550_v49 }
  0xc6   : > { %379 = vst [vmem:[%s726_s8 + $0x70] sm:$0xff] %v552_v50 }
  0xc7   : > { %566 = shalt.err (!%p563_p3)
}
  0xc8   : > { %s567_s27 = scalar_lea.hbm %s757_s19, 2048  ;;  %s571_s30 = scalar_lea.hbm %s808_s3, 8192 }
  0xc9   : > { %p568_p4 = scmp.ne.s32.totalorder %s757_s19, %s567_s27  ;;  %p572_p9 = scmp.lt.s32.totalorder %s757_s19, %s808_s3 }
  0xca   : > { %p573_p10 = scmp.lt.s32.totalorder %s571_s30, %s567_s27 }
  0xcb   : > { %p569_p7 = pnand %p568_p4, %p677_p5 }
  0xcc   : > { %p574_p11 = por %p573_p10, %p572_p9 }
  0xcd   : > { %p570_p8 = pneg %p569_p7 }
  0xcf   : > { %p575_p12 = pnand %p574_p11, %p570_p8 }
  0xd1   : > { %578 = shalt.err (!%p575_p12)
}
  0xd2   : > { %s617_s6 = smov 128   ;;  %s618_s7 = smov 8  }
  0xd3   : > { %477 = dma.vmem_to_hbm [thread:$0]  (%p677_p5), %s759_s10, 2048, %s757_s19, %s765_s16, %s617_s6, %s617_s6, %s618_s7  }
  0xd4 PF: > { %p483_p13 = scmp.ge.s32.totalorder %s613_s15, 2  ;;  %s411_s8 = sand.u32 1, %s601_s12  }
  0xd5   : > { %s412_s9 = scalar_lea.sflag [#allocation3], %s411_s8 }
  0xd6   : > { %p480_p0 = pnand %p483_p13, %p681_p6 }
  0xd8   : > { %p481_p1 = pneg %p480_p0 }
  0xda   : > { %596 = dma.done.wait (%p481_p1), %s412_s9, 2048  }
  0xdb   : > { %598 = vsyncadd (%p481_p1), %s412_s9, 4294965248  ;;  %p13_p2 = scmp.ge.s32.totalorder %s664_s18, 6   ;;  %s811_s12 = smov %s605_s13 }
  0xdc   : > { %s812_s13 = smov %s609_s14  ;;  %s813_s14 = smov %s675_s21 }
  0xdd   : > { %s814_s15 = smov %s664_s18  ;;  %15 = sbr.rel (!%p13_p2) target bundleno = 3 (0x3), region = 67 }
  0xe2   :  { %417 = vsyncpa [#allocation3], 1 }
  0xe3   :  { %419 = vsyncpa [#allocation3 + $0x1], 1 }

</bundles_post_ra>
